<compile_context>
chip_gen: v5e
topology: v5e:2x2
jax: 0.10.0
libtpu: 0.0.40
codegen_flags: <defaults>
</compile_context>

<pallas_src>
import math

import jax
import jax.numpy as jnp
import numpy as np
from jax.experimental import pallas as pl
from jax.experimental.pallas import tpu as pltpu

# ---- module hyperparameters (consistent with the module's __init__) ----
V_DIM = 32
L_DIM = 32
EMBED_DIM = 32
NUM_HEADS = 4
HEAD_DIM = EMBED_DIM // NUM_HEADS
SCALE = HEAD_DIM ** (-0.5)

BSZ = 2
N_IMG = 16   # tgt_len
N_TEXT = 8   # src_len


def _make_cross_attention_kernel(B, T, S):
    H, hd, E = NUM_HEADS, HEAD_DIM, EMBED_DIM

    def kernel(v_ref, l_ref, w_ref, b_ref, o_ref):
        # v_ref: (B*T, V_DIM)   l_ref: (B*S, L_DIM)
        # w_ref: (32, 4E) = [Wq^T*scale | Wk^T | Wvl^T | Wo^T]   b_ref: (1, 4E)
        v = v_ref[...]
        l = l_ref[...]
        w = w_ref[...]
        bias = b_ref[...]

        # --- projections: 2 MXU matmuls (scale pre-folded; k & vl fused) ---
        q2 = jnp.dot(v, w[:, :E], preferred_element_type=jnp.float32) + bias[:, :E]
        kv = (jnp.dot(l, w[:, E:3 * E], preferred_element_type=jnp.float32)
              + bias[:, E:3 * E])

        q3 = q2.reshape(B, T, E)
        k3 = kv[:, :E].reshape(B, S, E)
        vl3 = kv[:, E:].reshape(B, S, E)

        # --- move heads into the batch dim -> one batched einsum per matmul ---
        qh = jnp.concatenate([q3[:, :, h * hd:(h + 1) * hd] for h in range(H)], axis=0)   # (H*B, T, hd)
        kh = jnp.concatenate([k3[:, :, h * hd:(h + 1) * hd] for h in range(H)], axis=0)   # (H*B, S, hd)
        vh = jnp.concatenate([vl3[:, :, h * hd:(h + 1) * hd] for h in range(H)], axis=0)  # (H*B, S, hd)

        logits = jnp.einsum('ntd,nsd->nts', qh, kh,
                            preferred_element_type=jnp.float32)                           # (H*B, T, S)

        # Row-wise stable softmax over src_len. The module's global-max shift and
        # +/-50000 clamps are a mathematical no-op at these magnitudes (softmax is
        # shift-invariant, clamps can never trigger), so the extra XLU global
        # reductions are dropped.
        m = jnp.max(logits, axis=-1, keepdims=True)
        e = jnp.exp(logits - m)
        p = e / jnp.sum(e, axis=-1, keepdims=True)
        # TODO(synk): dropout (p=0.1) on attention probs skipped -- eval/inference semantics.

        oh = jnp.einsum('nts,nsd->ntd', p, vh,
                        preferred_element_type=jnp.float32)                               # (H*B, T, hd)

        # back to (B*T, E) with head-major columns, then output projection
        attn = jnp.concatenate([oh[h * B:(h + 1) * B] for h in range(H)], axis=-1)        # (B, T, E)
        attn = attn.reshape(B * T, E)
        o_ref[...] = (jnp.dot(attn, w[:, 3 * E:], preferred_element_type=jnp.float32)
                      + bias[:, 3 * E:])

    return kernel


def cross_attention(v, l, w_packed, b_packed):
    B, T, Dv = v.shape
    S, Dl = l.shape[1], l.shape[2]
    vmem = pl.BlockSpec(memory_space=pltpu.MemorySpace.VMEM)
    out2d = pl.pallas_call(
        _make_cross_attention_kernel(B, T, S),
        out_shape=jax.ShapeDtypeStruct((B * T, Dv), jnp.float32),
        in_specs=[vmem, vmem, vmem, vmem],
        out_specs=vmem,
    )(v.reshape(B * T, Dv), l.reshape(B * S, Dl), w_packed, b_packed)
    return out2d.reshape(B, T, Dv)


# ---------------- parameter init (torch-style xavier_uniform, zero bias) ----------------
def xavier_uniform(key, out_f, in_f):
    a = math.sqrt(6.0 / (in_f + out_f))
    return jax.random.uniform(key, (out_f, in_f), jnp.float32, -a, a)


def init_params(key):
    k1, k2, k3, k4 = jax.random.split(key, 4)
    return {
        'wq': xavier_uniform(k1, EMBED_DIM, V_DIM),   'bq': jnp.zeros((EMBED_DIM,), jnp.float32),
        'wk': xavier_uniform(k2, EMBED_DIM, L_DIM),   'bk': jnp.zeros((EMBED_DIM,), jnp.float32),
        'wvl': xavier_uniform(k3, EMBED_DIM, L_DIM),  'bvl': jnp.zeros((EMBED_DIM,), jnp.float32),
        'wo': xavier_uniform(k4, V_DIM, EMBED_DIM),   'bo': jnp.zeros((V_DIM,), jnp.float32),
    }


def pack_params(params):
    """One-time packing: (32, 128) weight slab + (1, 128) bias slab, scale folded into q."""
    w_packed = jnp.concatenate(
        [params['wq'].T * SCALE, params['wk'].T, params['wvl'].T, params['wo'].T], axis=1)
    b_packed = jnp.concatenate(
        [params['bq'] * SCALE, params['bk'], params['bvl'], params['bo']])[None, :]
    return w_packed, b_packed


# ---------------- pure-JAX reference (mirrors the PyTorch forward) ----------------
def ref_forward(v, l, params):
    B, T, _ = v.shape
    S = l.shape[1]
    q = (v @ params['wq'].T + params['bq']) * SCALE
    k = l @ params['wk'].T + params['bk']
    vl = l @ params['wvl'].T + params['bvl']

    def _shape(x, seq):
        return (x.reshape(B, seq, NUM_HEADS, HEAD_DIM)
                 .transpose(0, 2, 1, 3)
                 .reshape(B * NUM_HEADS, seq, HEAD_DIM))

    q, k, vl = _shape(q, T), _shape(k, S), _shape(vl, S)
    attn = jnp.matmul(q, jnp.transpose(k, (0, 2, 1)))
    attn = attn - jnp.max(attn)                      # stable_softmax_2d
    attn = jnp.clip(attn, -50000.0, 50000.0)         # clamp_min / clamp_max
    p = jax.nn.softmax(attn, axis=-1)
    o = jnp.matmul(p, vl)
    o = (o.reshape(B, NUM_HEADS, T, HEAD_DIM)
          .transpose(0, 2, 1, 3)
          .reshape(B, T, EMBED_DIM))
    return o @ params['wo'].T + params['bo']


if __name__ == "__main__":
    key = jax.random.PRNGKey(0)
    kv, kl, kp = jax.random.split(key, 3)
    v = jax.random.normal(kv, (BSZ, N_IMG, V_DIM), jnp.float32)
    l = jax.random.normal(kl, (BSZ, N_TEXT, L_DIM), jnp.float32)
    params = init_params(kp)
    w_packed, b_packed = pack_params(params)   # done once, outside the call path

    out = cross_attention(v, l, w_packed, b_packed)
    out = jax.block_until_ready(out)

    ref = jax.block_until_ready(ref_forward(v, l, params))
    assert out.shape == (BSZ, N_IMG, V_DIM)
    assert np.allclose(np.asarray(out), np.asarray(ref), rtol=1e-3, atol=1e-3), (
        "Pallas kernel disagrees with reference")
    print("KERNEL_OK")
</pallas_src>

<mosaic_0001>
module attributes {stable_mosaic.version = 11 : i64} {
  func.func @kernel(%arg0: memref<32x32xf32, #tpu.memory_space<vmem>>, %arg1: memref<16x32xf32, #tpu.memory_space<vmem>>, %arg2: memref<32x128xf32, #tpu.memory_space<vmem>>, %arg3: memref<1x128xf32, #tpu.memory_space<vmem>>, %arg4: memref<32x32xf32, #tpu.memory_space<vmem>>) attributes {dimension_semantics = [], scalar_prefetch = 0 : i64, scratch_operands = 0 : i64, tpu.core_type = #tpu.core_type<tc>} {
    %c0 = arith.constant 0 : index
    %c0_0 = arith.constant 0 : index
    %0 = vector.load %arg0[%c0, %c0_0] : memref<32x32xf32, #tpu.memory_space<vmem>>, vector<32x32xf32>
    %c0_1 = arith.constant 0 : index
    %c0_2 = arith.constant 0 : index
    %1 = vector.load %arg1[%c0_1, %c0_2] : memref<16x32xf32, #tpu.memory_space<vmem>>, vector<16x32xf32>
    %c0_3 = arith.constant 0 : index
    %c0_4 = arith.constant 0 : index
    %2 = vector.load %arg2[%c0_3, %c0_4] : memref<32x128xf32, #tpu.memory_space<vmem>>, vector<32x128xf32>
    %c0_5 = arith.constant 0 : index
    %c0_6 = arith.constant 0 : index
    %3 = vector.load %arg3[%c0_5, %c0_6] : memref<1x128xf32, #tpu.memory_space<vmem>>, vector<1x128xf32>
    %4 = vector.extract_strided_slice %2 {offsets = [0, 0], sizes = [32, 32], strides = [1, 1]} : vector<32x128xf32> to vector<32x32xf32>
    %cst = arith.constant dense<0.000000e+00> : vector<32x32xf32>
    %5 = tpu.matmul %0, %4, %cst {dimension_numbers = #tpu.dot_dimension_numbers<[1], [0], [0], [1], [0, 0, 1, 1], [], []>} : vector<32x32xf32>, vector<32x32xf32>, vector<32x32xf32> -> vector<32x32xf32>
    %6 = vector.extract_strided_slice %3 {offsets = [0, 0], sizes = [1, 32], strides = [1, 1]} : vector<1x128xf32> to vector<1x32xf32>
    %7 = vector.broadcast %6 : vector<1x32xf32> to vector<32x32xf32>
    %8 = arith.addf %5, %7 : vector<32x32xf32>
    %9 = vector.extract_strided_slice %2 {offsets = [0, 32], sizes = [32, 64], strides = [1, 1]} : vector<32x128xf32> to vector<32x64xf32>
    %cst_7 = arith.constant dense<0.000000e+00> : vector<16x64xf32>
    %10 = tpu.matmul %1, %9, %cst_7 {dimension_numbers = #tpu.dot_dimension_numbers<[1], [0], [0], [1], [0, 0, 1, 1], [], []>} : vector<16x32xf32>, vector<32x64xf32>, vector<16x64xf32> -> vector<16x64xf32>
    %11 = vector.extract_strided_slice %3 {offsets = [0, 32], sizes = [1, 64], strides = [1, 1]} : vector<1x128xf32> to vector<1x64xf32>
    %12 = vector.broadcast %11 : vector<1x64xf32> to vector<16x64xf32>
    %13 = arith.addf %10, %12 : vector<16x64xf32>
    %14 = vector.shape_cast %8 : vector<32x32xf32> to vector<2x16x32xf32>
    %15 = vector.extract_strided_slice %13 {offsets = [0, 0], sizes = [16, 32], strides = [1, 1]} : vector<16x64xf32> to vector<16x32xf32>
    %16 = vector.shape_cast %15 : vector<16x32xf32> to vector<2x8x32xf32>
    %17 = vector.extract_strided_slice %13 {offsets = [0, 32], sizes = [16, 32], strides = [1, 1]} : vector<16x64xf32> to vector<16x32xf32>
    %18 = vector.shape_cast %17 : vector<16x32xf32> to vector<2x8x32xf32>
    %19 = vector.extract_strided_slice %14 {offsets = [0, 0, 0], sizes = [2, 16, 8], strides = [1, 1, 1]} : vector<2x16x32xf32> to vector<2x16x8xf32>
    %20 = vector.extract_strided_slice %14 {offsets = [0, 0, 8], sizes = [2, 16, 8], strides = [1, 1, 1]} : vector<2x16x32xf32> to vector<2x16x8xf32>
    %21 = vector.extract_strided_slice %14 {offsets = [0, 0, 16], sizes = [2, 16, 8], strides = [1, 1, 1]} : vector<2x16x32xf32> to vector<2x16x8xf32>
    %22 = vector.extract_strided_slice %14 {offsets = [0, 0, 24], sizes = [2, 16, 8], strides = [1, 1, 1]} : vector<2x16x32xf32> to vector<2x16x8xf32>
    %23 = tpu.concatenate %19, %20, %21, %22 in 0 : vector<2x16x8xf32>, vector<2x16x8xf32>, vector<2x16x8xf32>, vector<2x16x8xf32> -> vector<8x16x8xf32>
    %24 = vector.extract_strided_slice %16 {offsets = [0, 0, 0], sizes = [2, 8, 8], strides = [1, 1, 1]} : vector<2x8x32xf32> to vector<2x8x8xf32>
    %25 = vector.extract_strided_slice %16 {offsets = [0, 0, 8], sizes = [2, 8, 8], strides = [1, 1, 1]} : vector<2x8x32xf32> to vector<2x8x8xf32>
    %26 = vector.extract_strided_slice %16 {offsets = [0, 0, 16], sizes = [2, 8, 8], strides = [1, 1, 1]} : vector<2x8x32xf32> to vector<2x8x8xf32>
    %27 = vector.extract_strided_slice %16 {offsets = [0, 0, 24], sizes = [2, 8, 8], strides = [1, 1, 1]} : vector<2x8x32xf32> to vector<2x8x8xf32>
    %28 = tpu.concatenate %24, %25, %26, %27 in 0 : vector<2x8x8xf32>, vector<2x8x8xf32>, vector<2x8x8xf32>, vector<2x8x8xf32> -> vector<8x8x8xf32>
    %29 = vector.extract_strided_slice %18 {offsets = [0, 0, 0], sizes = [2, 8, 8], strides = [1, 1, 1]} : vector<2x8x32xf32> to vector<2x8x8xf32>
    %30 = vector.extract_strided_slice %18 {offsets = [0, 0, 8], sizes = [2, 8, 8], strides = [1, 1, 1]} : vector<2x8x32xf32> to vector<2x8x8xf32>
    %31 = vector.extract_strided_slice %18 {offsets = [0, 0, 16], sizes = [2, 8, 8], strides = [1, 1, 1]} : vector<2x8x32xf32> to vector<2x8x8xf32>
    %32 = vector.extract_strided_slice %18 {offsets = [0, 0, 24], sizes = [2, 8, 8], strides = [1, 1, 1]} : vector<2x8x32xf32> to vector<2x8x8xf32>
    %33 = tpu.concatenate %29, %30, %31, %32 in 0 : vector<2x8x8xf32>, vector<2x8x8xf32>, vector<2x8x8xf32>, vector<2x8x8xf32> -> vector<8x8x8xf32>
    "tpu.trace_start"() <{level = 10 : i32, message = "ntd,nsd->nts"}> : () -> ()
    %cst_8 = arith.constant dense<0.000000e+00> : vector<8x16x8xf32>
    %34 = tpu.matmul %23, %28, %cst_8 {dimension_numbers = #tpu.dot_dimension_numbers<[2], [2], [1], [1], [0, 0, 0, 1, 1, 1], [0], [0]>} : vector<8x16x8xf32>, vector<8x8x8xf32>, vector<8x16x8xf32> -> vector<8x16x8xf32>
    "tpu.trace_stop"() : () -> ()
    %cst_9 = arith.constant dense<0xFF800000> : vector<8x16xf32>
    %35 = vector.multi_reduction <maximumf>, %34, %cst_9 [2] : vector<8x16x8xf32> to vector<8x16xf32>
    %36 = vector.shape_cast %35 : vector<8x16xf32> to vector<8x16x1xf32>
    %37 = vector.broadcast %36 : vector<8x16x1xf32> to vector<8x16x8xf32>
    %38 = arith.subf %34, %37 : vector<8x16x8xf32>
    %39 = math.exp %38 : vector<8x16x8xf32>
    %cst_10 = arith.constant dense<0.000000e+00> : vector<8x16xf32>
    %40 = vector.multi_reduction <add>, %39, %cst_10 [2] : vector<8x16x8xf32> to vector<8x16xf32>
    %41 = vector.shape_cast %40 : vector<8x16xf32> to vector<8x16x1xf32>
    %42 = vector.broadcast %41 : vector<8x16x1xf32> to vector<8x16x8xf32>
    %43 = arith.divf %39, %42 : vector<8x16x8xf32>
    "tpu.trace_start"() <{level = 10 : i32, message = "nts,nsd->ntd"}> : () -> ()
    %cst_11 = arith.constant dense<0.000000e+00> : vector<8x16x8xf32>
    %44 = tpu.matmul %43, %33, %cst_11 {dimension_numbers = #tpu.dot_dimension_numbers<[2], [1], [1], [2], [0, 0, 0, 1, 1, 2], [0], [0]>} : vector<8x16x8xf32>, vector<8x8x8xf32>, vector<8x16x8xf32> -> vector<8x16x8xf32>
    "tpu.trace_stop"() : () -> ()
    %45 = vector.extract_strided_slice %44 {offsets = [0, 0, 0], sizes = [2, 16, 8], strides = [1, 1, 1]} : vector<8x16x8xf32> to vector<2x16x8xf32>
    %46 = vector.extract_strided_slice %44 {offsets = [2, 0, 0], sizes = [2, 16, 8], strides = [1, 1, 1]} : vector<8x16x8xf32> to vector<2x16x8xf32>
    %47 = vector.extract_strided_slice %44 {offsets = [4, 0, 0], sizes = [2, 16, 8], strides = [1, 1, 1]} : vector<8x16x8xf32> to vector<2x16x8xf32>
    %48 = vector.extract_strided_slice %44 {offsets = [6, 0, 0], sizes = [2, 16, 8], strides = [1, 1, 1]} : vector<8x16x8xf32> to vector<2x16x8xf32>
    %49 = tpu.concatenate %45, %46, %47, %48 in 2 : vector<2x16x8xf32>, vector<2x16x8xf32>, vector<2x16x8xf32>, vector<2x16x8xf32> -> vector<2x16x32xf32>
    %50 = vector.shape_cast %49 : vector<2x16x32xf32> to vector<32x32xf32>
    %51 = vector.extract_strided_slice %2 {offsets = [0, 96], sizes = [32, 32], strides = [1, 1]} : vector<32x128xf32> to vector<32x32xf32>
    %cst_12 = arith.constant dense<0.000000e+00> : vector<32x32xf32>
    %52 = tpu.matmul %50, %51, %cst_12 {dimension_numbers = #tpu.dot_dimension_numbers<[1], [0], [0], [1], [0, 0, 1, 1], [], []>} : vector<32x32xf32>, vector<32x32xf32>, vector<32x32xf32> -> vector<32x32xf32>
    %53 = vector.extract_strided_slice %3 {offsets = [0, 96], sizes = [1, 32], strides = [1, 1]} : vector<1x128xf32> to vector<1x32xf32>
    %54 = vector.broadcast %53 : vector<1x32xf32> to vector<32x32xf32>
    %55 = arith.addf %52, %54 : vector<32x32xf32>
    %c0_13 = arith.constant 0 : index
    %c0_14 = arith.constant 0 : index
    %56 = vector.load %arg4[%c0_13, %c0_14] : memref<32x32xf32, #tpu.memory_space<vmem>>, vector<32x32xf32>
    tpu.vector_store %arg4[%c0_13, %c0_14], %55 {strides = array<i32>} : memref<32x32xf32, #tpu.memory_space<vmem>>, vector<32x32xf32>,
    return
  }
}

</mosaic_0001>

<bundles_post_ra>
// kernel: tpu_custom_call.1
= control target key start
LH: loop header
LB: loop body
LE: loop exit
PB: predicated region body
PF: predicated region fallthrough
CT: control target
= control target key end

     0   :  { %9 = vsyncpa [#allocation3], 0  ;;  %s2014_s0 = inlined_call_operand.hbm [shape: f32[32,32], index: 0, kind: input, shape index: {}]   ;;  %s2015_s1 = inlined_call_operand.hbm [shape: f32[16,32], index: 1, kind: input, shape index: {}]   ;;  %s2016_s2 = inlined_call_operand.hbm [shape: f32[32,128], index: 2, kind: input, shape index: {}]   ;;  %s2017_s3 = inlined_call_operand.vmem [shape: f32[1,128], index: 3, kind: input, shape index: {}]   ;;  %s2018_s4 = inlined_call_operand.hbm [shape: f32[32,32], index: 4, kind: output, shape index: {}]  }
   0x1   :  { %10 = vsyncpa [#allocation6], 0 }
   0x2   :  { %11 = vsyncpa [#allocation4], 0  ;;  %s29_s17 = sshll.u32 %s2015_s1, 4  ;;  %s1501_s18 = smov [#allocation5]   ;;  %s30_s17 = int_to_ptr.hbm [resolvable:$true] %s29_s17 }
   0x3   :  { %s31_s19 = sshll.u32 %s1501_s18, 4  ;;  %s16_s22 = sshll.u32 %s2014_s0, 4  ;;  %s32_s19 = int_to_ptr.vmem [resolvable:$true] %s31_s19  ;;  %s17_s22 = int_to_ptr.hbm [resolvable:$true] %s16_s22 }
   0x4   :  { %s1502_s23 = smov 128   ;;  %s1503_s24 = smov 8  }
   0x5   :  { %37 = dma.hbm_to_vmem [thread:$0]  %s30_s17, 256, %s32_s19, [#allocation6], %s1502_s23, %s1502_s23, %s1503_s24  }
   0x6   :  { %s1504_s25 = smov [#allocation2]   ;;  %s42_s1 = sshll.u32 %s2016_s2, 4  ;;  %s43_s1 = int_to_ptr.hbm [resolvable:$true] %s42_s1 }
   0x7   :  { %s18_s26 = sshll.u32 %s1504_s25, 4  ;;  %s1505_s0 = smov [#allocation7]   ;;  %s19_s26 = int_to_ptr.vmem [resolvable:$true] %s18_s26 }
   0x8   :  { %24 = dma.hbm_to_vmem [thread:$0]  %s17_s22, 512, %s19_s26, [#allocation3], %s1502_s23, %s1502_s23, %s1503_s24  }
   0x9   :  { %s44_s29 = sshll.u32 %s1505_s0, 4  ;;  %s45_s29 = int_to_ptr.vmem [resolvable:$true] %s44_s29 }
   0xa   :  { %50 = dma.hbm_to_vmem [thread:$0]  %s43_s1, 512, %s45_s29, [#allocation6], %s1502_s23, %s1502_s23, %s1503_s24  }
   0xb   :  { %1495 = dma.done.wait [#allocation3], 512  }
   0xc   :  { %1496 = vsyncadd [#allocation3], 4294966784 }
   0xd   :  { %1497 = dma.done.wait [#allocation6], 768  }
   0xe   :  { %1498 = vsyncadd [#allocation6], 4294966528  ;;  %v73_v0 = vld [vmem:[#allocation7 + $0x10] sm:$0xff]  ;;  %v74_v1 = vld [vmem:[#allocation7 + $0x18] sm:$0xff]  ;;  %s1506_s2 = smov 96   ;;  %vm79_vm0 = vcmask 261120  }
   0xf   :  { %v1294_v2 = vpack.i.bf16 %v73_v0, %v74_v1  ;;  %104 = vmatpush.msra.mxu0 %v74_v1  ;;  %v71_v3 = vld [vmem:[#allocation7] sm:$0xff]  ;;  %v72_v4 = vld [vmem:[#allocation7 + $0x8] sm:$0xff]  ;;  %v65_v5 = vld [vmem:[#allocation2] sm:$0xff]  ;;  %s1507_s6 = smov 120   ;;  %s1508_s7 = smov 104   ;;  %vm211_vm1 = vcmask 64512  }
  0x10   :  { %v1299_v6 = vpack.i.bf16 %v71_v3, %v72_v4  ;;  %v66_v7 = vld [vmem:[#allocation2 + $0x8] sm:$0xff]  ;;  %v67_v8 = vld [vmem:[#allocation2 + $0x10] sm:$0xff]  ;;  %v1329_v9 = vld [vmem:[%s2017_s3] ss:$0 sm:$0xff]  ;;  %s1509_s8 = smov 112   ;;  %s1510_s9 = smov 32  }
  0x11   :  { %1295 = vrot.lane.b32.xlu0 %v1294_v2, %s1506_s2  ;;  %105 = vmatpush.msra.mxu0 %v73_v0  ;;  %v68_v10 = vld [vmem:[#allocation2 + $0x18] sm:$0xff]  ;;  %v69_v17 = vld [vmem:[#allocation5] sm:$0xff]  ;;  %v70_v18 = vld [vmem:[#allocation5 + $0x8] sm:$0xff]  ;;  %s1511_s10 = smov 16   ;;  %s1512_s11 = smov 24  }
  0x12   :  { %137 = vrot.lane.b32.xlu1 %v1329_v9, %s1506_s2  ;;  %s1212_s17 = sshll.u32 %s2018_s4, 4  ;;  %s1213_s17 = int_to_ptr.hbm [resolvable:$true] %s1212_s17 }
  0x13   :  { %106 = vmatpush.msra.mxu0 %v72_v4 }
  0x15   :  { %107 = vmatpush.msra.mxu0 %v71_v3 }
  0x16   :  { %1226 = vmatmul.msk.f32.vlgmr.msra.gmra.mxu0 %vm79_vm0, %v65_v5 }
  0x19   :  { %1300 = vrot.lane.b32.xlu0 %v1299_v6, %s1506_s2 }
  0x1e   :  { %1227 = vmatmul.msk.f32.gmra.mxu0 %vm79_vm0, %v66_v7 }
  0x26   :  { %1228 = vmatmul.msk.f32.gmra.mxu0 %vm79_vm0, %v67_v8 }
  0x2e   :  { %1229 = vmatmul.msk.f32.gmra.mxu0 %vm79_vm0, %v68_v10 }
  0x83   :  { %v1296_v11 = vpop.permute.xlu0 %1295 }
  0x84   :  { %v1297_v12 = vunpack.i.l.bf16 %v1296_v11  ;;  %v1298_v13 = vunpack.i.h.bf16 %v1296_v11  ;;  %v138_v25 = vpop.permute.xlu1 %137 }
  0x86   :  { %158 = vmatpush.msra.mxu1 %v1297_v12  ;;  %1276 = vmatpush.msra.mxu2 %v1297_v12 }
  0x88   :  { %159 = vmatpush.msra.mxu1 %v1298_v13  ;;  %1277 = vmatpush.msra.mxu2 %v1298_v13 }
  0x8b   :  { %v1301_v14 = vpop.permute.xlu0 %1300 }
  0x8c   :  { %v1302_v15 = vunpack.i.l.bf16 %v1301_v14  ;;  %v1303_v16 = vunpack.i.h.bf16 %v1301_v14 }
  0x8e   :  { %160 = vmatpush.msra.mxu1 %v1302_v15  ;;  %1278 = vmatpush.msra.mxu2 %v1302_v15 }
  0x90   :  { %161 = vmatpush.msra.mxu1 %v1303_v16  ;;  %1279 = vmatpush.msra.mxu2 %v1303_v16 }
  0x91   :  { %1230 = vmatmul.msk.f32.vlgmr.msra.gmra.mxu1 %vm79_vm0, %v69_v17  ;;  %1231 = vmatmul.msk.f32.vlgmr.msra.gmra.mxu2 %vm79_vm0, %v70_v18 }
  0x93   :  { %v109_v19 = vpop.f32.mrf.mxu0 }
  0x94   :  { %v110_v20 = vadd.f32 %v1329_v9, %v109_v19 }
  0x96   :  { %173 = vrot.lane.b32.xlu0 %v110_v20, %s1507_s6 }
  0x9b   :  { %v112_v21 = vpop.f32.mrf.mxu0 }
  0x9c   :  { %v113_v22 = vadd.f32 %v1329_v9, %v112_v21 }
  0x9e   :  { %175 = vrot.lane.b32.xlu0 %v113_v22, %s1507_s6 }
  0xa3   :  { %v115_v23 = vpop.f32.mrf.mxu0 }
  0xa4   :  { %v116_v24 = vadd.f32 %v1329_v9, %v115_v23 }
  0xa6   :  { %189 = vrot.lane.b32.xlu0 %v110_v20, %s1508_s7  ;;  %177 = vrot.lane.b32.xlu2 %v116_v24, %s1507_s6 }
  0xab   :  { %v118_v30 = vpop.f32.mrf.mxu0 }
  0xac   :  { %v119_v31 = vadd.f32 %v1329_v9, %v118_v30 }
 0x100   :  { %v178_v32 = vpop.permute.xlu2 %177 }
 0x108   :  { %v174_v34 = vpop.permute.xlu0 %173 }
 0x10e   :  { %v163_v26 = vpop.f32.mrf.mxu1 }
 0x10f   :  { %v1570_v27 = vadd.f32 %v163_v26, %v138_v25 }
 0x110   :  { %v176_v36 = vpop.permute.xlu0 %175 }
 0x111   :  { %1232 = vmatpush.xpose.msk.msrb.mxu2 %vm211_vm1, %v1570_v27  ;;  %199 = vrot.lane.b32.xlu2 %v1570_v27, %s1507_s6 }
 0x114   :  { %v166_v28 = vpop.f32.mrf.mxu2  ;;  %1233 = vmatmul.msk.f32.vlgmr.msrb.gmra.mxu2 %vm211_vm1, %v110_v20 }
 0x115   :  { %v1576_v29 = vadd.f32 %v166_v28, %v138_v25 }
 0x117   :  { %201 = vrot.lane.b32.xlu1 %v1576_v29, %s1507_s6  ;;  %1235 = vmatpush.xpose.msk.msra.mxu3 %vm211_vm1, %v1576_v29 }
 0x118   :  { %205 = vrot.lane.b32.xlu0 %v1576_v29, %s1509_s8  ;;  %v190_v38 = vpop.permute.xlu0 %189 }
 0x119   :  { %203 = vrot.lane.b32.xlu2 %v1570_v27, %s1509_s8 }
 0x11a   :  { %1236 = vmatmul.msk.f32.vlgmr.msra.gmra.mxu3 %vm211_vm1, %v116_v24 }
 0x11c   :  { %1234 = vmatmul.msk.f32.gmra.mxu2 %vm211_vm1, %v113_v22 }
 0x11f   :  { %179 = vrot.lane.b32.xlu1 %v119_v31, %s1507_s6 }
 0x120   :  { %209 = vrot.lane.b32.xlu0 %v1576_v29, %s1508_s7 }
 0x121   :  { %207 = vrot.lane.b32.xlu2 %v1570_v27, %s1508_s7 }
 0x122   :  { %1237 = vmatmul.msk.f32.gmra.mxu3 %vm211_vm1, %v119_v31 }
 0x127   :  { %183 = vrot.lane.b32.xlu1 %v113_v22, %s1509_s8 }
 0x129   :  { %181 = vrot.lane.b32.xlu2 %v110_v20, %s1509_s8 }
 0x12f   :  { %191 = vrot.lane.b32.xlu1 %v113_v22, %s1508_s7 }
 0x131   :  { %187 = vrot.lane.b32.xlu2 %v119_v31, %s1509_s8 }
 0x137   :  { %185 = vrot.lane.b32.xlu1 %v116_v24, %s1509_s8 }
 0x139   :  { %195 = vrot.lane.b32.xlu2 %v119_v31, %s1508_s7 }
 0x13f   :  { %193 = vrot.lane.b32.xlu1 %v116_v24, %s1508_s7 }
 0x16b   :  { %v1593_v33 = vpop.permute.xlu2 %199 }
 0x16c   :  { %1238 = vmatpush.xpose.msk.msra.mxu2 %vm211_vm1, %v1593_v33 }
 0x16f   :  { %1239 = vmatmul.msk.f32.vlgmr.msra.gmra.mxu2 %vm211_vm1, %v174_v34 }
 0x173   :  { %v1598_v35 = vpop.permute.xlu2 %203 }
 0x174   :  { %1244 = vmatpush.xpose.msk.msrb.mxu1 %vm211_vm1, %v1598_v35 }
 0x177   :  { %1240 = vmatmul.msk.f32.gmra.mxu2 %vm211_vm1, %v176_v36 }
 0x17b   :  { %v1603_v37 = vpop.permute.xlu2 %207 }
 0x183   :  { %v182_v39 = vpop.permute.xlu2 %181 }
 0x184   :  { %1245 = vmatmul.msk.f32.vlgmr.msrb.gmra.mxu1 %vm211_vm1, %v182_v39 }
 0x189   :  { %v1606_v40 = vpop.permute.xlu1 %201 }
 0x18a   :  { %v1314_v41 = vpack.i.bf16 %v1606_v40, %v1598_v35  ;;  %v1610_v42 = vpop.permute.xlu0 %205  ;;  %1241 = vmatpush.xpose.msk.msrb.mxu3 %vm211_vm1, %v1606_v40 }
 0x18b   :  { %1247 = vmatpush.xpose.msk.msrb.mxu2 %vm211_vm1, %v1610_v42  ;;  %v188_v56 = vpop.permute.xlu2 %187 }
 0x18d   :  { %1242 = vmatmul.msk.f32.vlgmr.msrb.gmra.mxu3 %vm211_vm1, %v178_v32 }
 0x18e   :  { %1280 = vmatpush.xpose.msk.msra.mxu3 %vm211_vm1, %v1598_v35 }
 0x191   :  { %v180_v43 = vpop.permute.xlu1 %179 }
 0x192   :  { %1250 = vmatpush.xpose.msk.msrb.mxu3 %vm211_vm1, %v1603_v37  ;;  %v1621_v44 = vpop.permute.xlu0 %209 }
 0x193   :  { %1253 = vmatpush.xpose.msk.msrb.mxu0 %vm211_vm1, %v1621_v44  ;;  %v196_v58 = vpop.permute.xlu2 %195 }
 0x195   :  { %1243 = vmatmul.msk.f32.gmra.mxu3 %vm211_vm1, %v180_v43 }
 0x197   :  { %v235_v45 = vpop.f32.mrf.mxu2 }
 0x198   :  { %v444_v46 = vsel %vm211_vm1, %v235_v45, -inf }
 0x199   :  { %v184_v47 = vpop.permute.xlu1 %183  ;;  %445 = vmax.xlane.f32.xlu1 %v444_v46 }
 0x19d   :  { %v264_v48 = vpop.f32.mrf.mxu3  ;;  %1246 = vmatmul.msk.f32.vlgmr.msra.gmra.mxu3 %vm211_vm1, %v184_v47 }
 0x19e   :  { %v450_v49 = vsel %vm211_vm1, %v264_v48, -inf }
 0x19f   :  { %451 = vmax.xlane.f32.xlu0 %v450_v49  ;;  %v238_v50 = vpop.f32.mrf.mxu2 }
 0x1a0   :  { %v447_v51 = vsel %vm211_vm1, %v238_v50, -inf }
 0x1a1   :  { %v192_v52 = vpop.permute.xlu1 %191  ;;  %448 = vmax.xlane.f32.xlu2 %v447_v51 }
 0x1a5   :  { %v267_v53 = vpop.f32.mrf.mxu3  ;;  %1251 = vmatmul.msk.f32.vlgmr.msrb.gmra.mxu3 %vm211_vm1, %v190_v38 }
 0x1a6   :  { %v453_v54 = vsel %vm211_vm1, %v267_v53, -inf }
 0x1a7   :  { %454 = vmax.xlane.f32.xlu1 %v453_v54 }
 0x1a9   :  { %v186_v55 = vpop.permute.xlu1 %185 }
 0x1aa   :  { %1248 = vmatmul.msk.f32.vlgmr.msrb.gmra.mxu2 %vm211_vm1, %v186_v55 }
 0x1ad   :  { %1252 = vmatmul.msk.f32.gmra.mxu3 %vm211_vm1, %v192_v52 }
 0x1b1   :  { %v194_v57 = vpop.permute.xlu1 %193 }
 0x1b2   :  { %1249 = vmatmul.msk.f32.gmra.mxu2 %vm211_vm1, %v188_v56  ;;  %1254 = vmatmul.msk.f32.vlgmr.msrb.gmra.mxu0 %vm211_vm1, %v194_v57 }
 0x1ba   :  { %1255 = vmatmul.msk.f32.gmra.mxu0 %vm211_vm1, %v196_v58 }
 0x1f2   :  { %v1637_v59 = vpop.f32.mrf.mxu2 }
 0x1f3   :  { %v456_v60 = vsel %vm211_vm1, %v1637_v59, -inf }
 0x1f4   :  { %457 = vmax.xlane.f32.xlu0 %v456_v60 }
 0x1fa   :  { %v1645_v63 = vpop.f32.mrf.mxu2 }
 0x1fb   :  { %v459_v0 = vsel %vm211_vm1, %v1645_v63, -inf }
 0x201   :  { %v1641_v61 = vpop.f32.mrf.mxu1 }
 0x202   :  { %v468_v62 = vsel %vm211_vm1, %v1641_v61, -inf }
 0x203   :  { %469 = vmax.xlane.f32.xlu2 %v468_v62 }
 0x20b   :  { %460 = vmax.xlane.f32.xlu2 %v459_v0 }
 0x20c   :  { %v446_v1 = vpop.xlane.xlu1 %445 }
 0x20d   :  { %v492_v2 = vsub.f32 %v235_v45, %v446_v1 }
 0x20f   :  { %v508_v3 = vmul.f32 1.442695, %v492_v2 }
 0x210   :  { %v1649_v4 = vpop.f32.mrf.mxu3 }
 0x211   :  { %1330 = vpow2.f32 %v508_v3  ;;  %v462_v28 = vsel %vm211_vm1, %v1649_v4, -inf }
 0x212   :  { %v452_v5 = vpop.xlane.xlu0 %451 }
 0x213   :  { %v494_v7 = vsub.f32 %v264_v48, %v452_v5  ;;  %v1304_v48 = vpack.i.bf16 %v1570_v27, %v1593_v33 }
 0x214   :  { %v449_v15 = vpop.xlane.xlu2 %448 }
 0x215   :  { %v512_v9 = vmul.f32 1.442695, %v494_v7  ;;  %v493_v18 = vsub.f32 %v238_v50, %v449_v15 }
 0x217   :  { %v1651_v6 = vpop.eup %1330  ;;  %1332 = vpow2.f32 %v512_v9  ;;  %v510_v23 = vmul.f32 1.442695, %v493_v18 }
 0x218   :  { %v540_v8 = vsel %vm211_vm1, %v1651_v6, 0.0  ;;  %v1655_v10 = vpop.f32.mrf.mxu3 }
 0x219   :  { %541 = vadd.xlane.f32.xlu1 %v540_v8  ;;  %v465_v11 = vsel %vm211_vm1, %v1655_v10, -inf }
 0x21a   :  { %v455_v14 = vpop.xlane.xlu1 %454 }
 0x21b   :  { %v495_v16 = vsub.f32 %v267_v53, %v455_v14 }
 0x21d   :  { %v1659_v12 = vpop.eup %1332  ;;  %v514_v21 = vmul.f32 1.442695, %v495_v16 }
 0x21e   :  { %v546_v13 = vsel %vm211_vm1, %v1659_v12, 0.0 }
 0x21f   :  { %1334 = vpow2.f32 %v514_v21 }
 0x220   :  { %v1669_v22 = vpop.f32.mrf.mxu3  ;;  %1336 = vpow2.f32 %v510_v23 }
 0x221   :  { %466 = vmax.xlane.f32.xlu1 %v465_v11  ;;  %v471_v46 = vsel %vm211_vm1, %v1669_v22, -inf }
 0x225   :  { %v1681_v31 = vpop.eup %1334 }
 0x226   :  { %v1685_v34 = vpop.eup %1336  ;;  %v549_v36 = vsel %vm211_vm1, %v1681_v31, 0.0 }
 0x227   :  { %v543_v38 = vsel %vm211_vm1, %v1685_v34, 0.0 }
 0x228   :  { %v1683_v32 = vpop.f32.mrf.mxu3 }
 0x229   :  { %547 = vadd.xlane.f32.xlu1 %v546_v13  ;;  %v480_v45 = vsel %vm211_vm1, %v1683_v32, -inf }
 0x22d   :  { %v1663_v17 = vpop.f32.mrf.mxu2 }
 0x22e   :  { %v474_v39 = vsel %vm211_vm1, %v1663_v17, -inf }
 0x22f   :  { %v1665_v19 = vpop.f32.mrf.mxu0 }
 0x230   :  { %v486_v20 = vsel %vm211_vm1, %v1665_v19, -inf  ;;  %v1693_v43 = vpop.f32.mrf.mxu3 }
 0x231   :  { %487 = vmax.xlane.f32.xlu0 %v486_v20  ;;  %v483_v47 = vsel %vm211_vm1, %v1693_v43, -inf }
 0x235   :  { %v1671_v24 = vpop.f32.mrf.mxu2 }
 0x236   :  { %v477_v25 = vsel %vm211_vm1, %v1671_v24, -inf }
 0x237   :  { %v1675_v26 = vpop.f32.mrf.mxu0  ;;  %478 = vmax.xlane.f32.xlu1 %v477_v25 }
 0x238   :  { %v489_v30 = vsel %vm211_vm1, %v1675_v26, -inf }
 0x239   :  { %463 = vmax.xlane.f32.xlu0 %v462_v28  ;;  %490 = vmax.xlane.f32.xlu2 %v489_v30 }
 0x23f   :  { %550 = vadd.xlane.f32.xlu1 %v549_v36 }
 0x241   :  { %544 = vadd.xlane.f32.xlu0 %v543_v38  ;;  %475 = vmax.xlane.f32.xlu2 %v474_v39 }
 0x247   :  { %481 = vmax.xlane.f32.xlu1 %v480_v45 }
 0x249   :  { %472 = vmax.xlane.f32.xlu0 %v471_v46  ;;  %484 = vmax.xlane.f32.xlu2 %v483_v47 }
 0x25d   :  { %1305 = vrot.lane.b32.xlu0 %v1304_v48, %s1506_s2 }
 0x267   :  { %v458_v49 = vpop.xlane.xlu0 %457 }
 0x268   :  { %v496_v50 = vsub.f32 %v1637_v59, %v458_v49 }
 0x26a   :  { %v516_v53 = vmul.f32 1.442695, %v496_v50 }
 0x276   :  { %v470_v51 = vpop.xlane.xlu2 %469 }
 0x277   :  { %v500_v52 = vsub.f32 %v1641_v61, %v470_v51 }
 0x279   :  { %v524_v54 = vmul.f32 1.442695, %v500_v52 }
 0x27b   :  { %1338 = vpow2.f32 %v524_v54 }
 0x27c   :  { %1340 = vpow2.f32 %v516_v53 }
 0x27e   :  { %v461_v0 = vpop.xlane.xlu2 %460 }
 0x27f   :  { %v497_v7 = vsub.f32 %v1645_v63, %v461_v0 }
 0x281   :  { %v1706_v55 = vpop.eup %1338  ;;  %v518_v9 = vmul.f32 1.442695, %v497_v7 }
 0x282   :  { %v564_v56 = vsel %vm211_vm1, %v1706_v55, 0.0  ;;  %v1710_v57 = vpop.eup %1340 }
 0x283   :  { %565 = vadd.xlane.f32.xlu1 %v564_v56  ;;  %v552_v27 = vsel %vm211_vm1, %v1710_v57, 0.0 }
 0x287   :  { %553 = vadd.xlane.f32.xlu0 %v552_v27 }
 0x28c   :  { %v542_v33 = vpop.xlane.xlu1 %541 }
 0x28d   :  { %v599_v46 = vand.u32 2147483648, %v542_v33  ;;  %vm593_vm3 = vweird.f32 %v542_v33  ;;  %v597_v49 = vand.u32 2147483647, %v542_v33 }
 0x28f   :  { %v600_v52 = vor.u32 1.1754944e-38, %v599_v46  ;;  %vm598_vm5 = vcmp.eq.f32.partialorder %v597_v49, 8.507059e+37 }
 0x294   :  { %v467_v58 = vpop.xlane.xlu1 %466 }
 0x295   :  { %v499_v59 = vsub.f32 %v1655_v10, %v467_v58 }
 0x297   :  { %v522_v60 = vmul.f32 1.442695, %v499_v59 }
 0x299   :  { %1342 = vpow2.f32 %v522_v60 }
 0x29f   :  { %v1715_v61 = vpop.eup %1342 }
 0x2a0   :  { %v561_v62 = vsel %vm211_vm1, %v1715_v61, 0.0 }
 0x2a1   :  { %562 = vadd.xlane.f32.xlu0 %v561_v62 }
 0x2a4   :  { %v488_v1 = vpop.xlane.xlu0 %487 }
 0x2a5   :  { %v506_v23 = vsub.f32 %v1665_v19, %v488_v1 }
 0x2a7   :  { %v536_v36 = vmul.f32 1.442695, %v506_v23 }
 0x2ac   :  { %v464_v2 = vpop.xlane.xlu0 %463  ;;  %v1719_v3 = vpop.xlane.xlu2 %490 }
 0x2ad   :  { %v498_v5 = vsub.f32 %v1649_v4, %v464_v2 }
 0x2af   :  { %v520_v8 = vmul.f32 1.442695, %v498_v5 }
 0x2b1   :  { %1344 = vpow2.f32 %v520_v8  ;;  %v1309_v8 = vpack.i.bf16 %v1603_v37, %v1576_v29 }
 0x2b2   :  { %1346 = vrcp.f32 %v542_v33 }
 0x2b3   :  { %1348 = vpow2.f32 %v518_v9 }
 0x2b4   :  { %v1723_v10 = vpop.xlane.xlu0 %544  ;;  %v476_v11 = vpop.xlane.xlu2 %475 }
 0x2b5   :  { %988 = vrot.lane.b32.xlu0 %v1610_v42, %s1506_s2  ;;  %v502_v14 = vsub.f32 %v1663_v17, %v476_v11  ;;  %1350 = vrcp.f32 %v1723_v10  ;;  %v614_v58 = vand.u32 2147483648, %v1723_v10  ;;  %vm608_vm7 = vweird.f32 %v1723_v10 }
 0x2b6   :  { %v612_v0 = vand.u32 2147483647, %v1723_v10 }
 0x2b7   :  { %v1727_v13 = vpop.eup %1344  ;;  %v528_v16 = vmul.f32 1.442695, %v502_v14  ;;  %v615_v2 = vor.u32 1.1754944e-38, %v614_v58 }
 0x2b8   :  { %v1347_v15 = vpop.eup %1346  ;;  %v558_v4 = vsel %vm211_vm1, %v1727_v13, 0.0  ;;  %vm613_vm9 = vcmp.eq.f32.partialorder %v612_v0, 8.507059e+37 }
 0x2b9   :  { %559 = vadd.xlane.f32.xlu2 %v558_v4  ;;  %v589_v63 = vmul.f32 %v1347_v15, %v542_v33  ;;  %v1733_v20 = vpop.eup %1348  ;;  %1352 = vpow2.f32 %v528_v16  ;;  %vm594_vm2 = vweird.f32 %v1347_v15 }
 0x2ba   :  { %v555_v28 = vsel %vm211_vm1, %v1733_v20, 0.0  ;;  %vm595_vm4 = vmor %vm593_vm3, %vm594_vm2 }
 0x2bb   :  { %v590_v42 = vsub.f32 1.0, %v589_v63  ;;  %v1351_v17 = vpop.eup %1350 }
 0x2bc   :  { %v473_v18 = vpop.xlane.xlu0 %472  ;;  %v604_v38 = vmul.f32 %v1351_v17, %v1723_v10  ;;  %vm609_vm6 = vweird.f32 %v1351_v17  ;;  %v507_v10 = vsub.f32 %v1675_v26, %v1719_v3 }
 0x2bd   :  { %v501_v21 = vsub.f32 %v1669_v22, %v473_v18  ;;  %v591_v30 = vmul.f32 %v1347_v15, %v590_v42  ;;  %vm610_vm8 = vmor %vm608_vm7, %vm609_vm6 }
 0x2be   :  { %v605_v19 = vsub.f32 1.0, %v604_v38  ;;  %v538_v14 = vmul.f32 1.442695, %v507_v10 }
 0x2bf   :  { %v526_v25 = vmul.f32 1.442695, %v501_v21  ;;  %v1740_v39 = vpop.eup %1352  ;;  %v592_v22 = vadd.f32 %v1347_v15, %v591_v30 }
 0x2c0   :  { %v570_v47 = vsel %vm211_vm1, %v1740_v39, 0.0  ;;  %v606_v51 = vmul.f32 %v1351_v17, %v605_v19 }
 0x2c1   :  { %1354 = vpow2.f32 %v526_v25  ;;  %556 = vadd.xlane.f32.xlu2 %v555_v28  ;;  %v596_v50 = vsel %vm595_vm4, %v1347_v15, %v592_v22  ;;  %v485_v28 = vpop.xlane.xlu2 %484 }
 0x2c2   :  { %1356 = vpow2.f32 %v536_v36  ;;  %v601_v54 = vsel %vm598_vm5, %v600_v52, %v596_v50  ;;  %v607_v27 = vadd.f32 %v1351_v17, %v606_v51 }
 0x2c3   :  { %v602_v62 = vmul.f32 %v1651_v6, %v601_v54  ;;  %v1762_v6 = vpop.xlane.xlu1 %547 }
 0x2c4   :  { %v611_v1 = vsel %vm610_vm8, %v1351_v17, %v607_v27 }
 0x2c5   :  { %v616_v5 = vsel %vm613_vm9, %v615_v2, %v611_v1 }
 0x2c6   :  { %v617_v7 = vmul.f32 %v1685_v34, %v616_v5 }
 0x2c7   :  { %v1742_v45 = vpop.eup %1354 }
 0x2c8   :  { %v567_v48 = vsel %vm211_vm1, %v1742_v45, 0.0  ;;  %v1748_v53 = vpop.eup %1356 }
 0x2c9   :  { %571 = vadd.xlane.f32.xlu2 %v570_v47  ;;  %568 = vadd.xlane.f32.xlu1 %v567_v48  ;;  %v582_v33 = vsel %vm211_vm1, %v1748_v53, 0.0 }
 0x2cb   :  { %v479_v9 = vpop.xlane.xlu1 %478 }
 0x2cc   :  { %v503_v29 = vsub.f32 %v1671_v24, %v479_v9 }
 0x2ce   :  { %v530_v4 = vmul.f32 1.442695, %v503_v29 }
 0x2cf   :  { %v1306_v56 = vpop.permute.xlu0 %1305 }
 0x2d0   :  { %v1308_v59 = vunpack.i.h.bf16 %v1306_v56  ;;  %v1307_v60 = vunpack.i.l.bf16 %v1306_v56 }
 0x2d1   :  { %583 = vadd.xlane.f32.xlu2 %v582_v33 }
 0x2d2   :  { %852 = vmatpush.msra.mxu1 %v1308_v59  ;;  %916 = vmatpush.msra.mxu3 %v1307_v60 }
 0x2d3   :  { %1256 = vmatmul.msk.f32.vlgmr.msra.gmra.mxu1 %vm211_vm1, %v602_v62  ;;  %v1770_v34 = vpop.xlane.xlu1 %550 }
 0x2db   :  { %1257 = vmatmul.msk.f32.gmra.mxu1 %vm211_vm1, %v617_v7  ;;  %v482_v16 = vpop.xlane.xlu1 %481 }
 0x2dc   :  { %v504_v26 = vsub.f32 %v1683_v32, %v482_v16  ;;  %v505_v32 = vsub.f32 %v1693_v43, %v485_v28 }
 0x2de   :  { %v532_v25 = vmul.f32 1.442695, %v504_v26  ;;  %v534_v38 = vmul.f32 1.442695, %v505_v32 }
 0x2e2   :  { %1310 = vrot.lane.b32.xlu1 %v1309_v8, %s1506_s2 }
 0x2e9   :  { %1315 = vrot.lane.b32.xlu2 %v1314_v41, %s1506_s2 }
 0x2f6   :  { %v1793_v47 = vpop.xlane.xlu1 %565 }
 0x2f7   :  { %vm713_vm3 = vweird.f32 %v1793_v47 }
 0x2fa   :  { %v554_v11 = vpop.xlane.xlu0 %553 }
 0x2fb   :  { %1358 = vrcp.f32 %v554_v11  ;;  %v659_v18 = vand.u32 2147483648, %v554_v11  ;;  %v657_v40 = vand.u32 2147483647, %v554_v11  ;;  %vm653_vm11 = vweird.f32 %v554_v11 }
 0x2fc   :  { %1360 = vpow2.f32 %v538_v14 }
 0x2fd   :  { %1362 = vpow2.f32 %v530_v4  ;;  %v660_v21 = vor.u32 1.1754944e-38, %v659_v18  ;;  %vm658_vm13 = vcmp.eq.f32.partialorder %v657_v40, 8.507059e+37  ;;  %v717_v4 = vand.u32 2147483647, %v1793_v47 }
 0x2fe   :  { %1364 = vpow2.f32 %v532_v25 }
 0x2ff   :  { %1366 = vpow2.f32 %v534_v38 }
 0x300   :  { %1368 = vrcp.f32 %v1793_v47 }
 0x301   :  { %v1359_v37 = vpop.eup %1358 }
 0x302   :  { %v649_v15 = vmul.f32 %v1359_v37, %v554_v11  ;;  %vm654_vm10 = vweird.f32 %v1359_v37  ;;  %v1773_v41 = vpop.eup %1360 }
 0x303   :  { %vm655_vm12 = vmor %vm653_vm11, %vm654_vm10  ;;  %v585_v23 = vsel %vm211_vm1, %v1773_v41, 0.0  ;;  %v1779_v30 = vpop.eup %1362  ;;  %vm718_vm10 = vcmp.eq.f32.partialorder %v717_v4, 8.507059e+37  ;;  %vm623_vm11 = vweird.f32 %v1762_v6 }
 0x304   :  { %v650_v63 = vsub.f32 1.0, %v649_v15  ;;  %v573_v36 = vsel %vm211_vm1, %v1779_v30, 0.0  ;;  %v1785_v22 = vpop.eup %1364 }
 0x305   :  { %v576_v19 = vsel %vm211_vm1, %v1785_v22, 0.0 }
 0x306   :  { %v651_v35 = vmul.f32 %v1359_v37, %v650_v63  ;;  %v719_v63 = vand.u32 2147483648, %v1793_v47 }
 0x308   :  { %v652_v3 = vadd.f32 %v1359_v37, %v651_v35 }
 0x30a   :  { %v656_v24 = vsel %vm655_vm12, %v1359_v37, %v652_v3 }
 0x30b   :  { %v661_v42 = vsel %vm658_vm13, %v660_v21, %v656_v24 }
 0x30c   :  { %586 = vadd.xlane.f32.xlu1 %v585_v23  ;;  %v662_v17 = vmul.f32 %v1710_v57, %v661_v42  ;;  %v1789_v57 = vpop.eup %1366 }
 0x30d   :  { %v579_v46 = vsel %vm211_vm1, %v1789_v57, 0.0  ;;  %v1800_v48 = vpop.eup %1368 }
 0x30e   :  { %1260 = vmatmul.msk.f32.vlgmr.msra.gmra.mxu3 %vm211_vm1, %v662_v17  ;;  %v709_v54 = vmul.f32 %v1800_v48, %v1793_v47  ;;  %vm714_vm15 = vweird.f32 %v1800_v48 }
 0x30f   :  { %vm1853_vm6 = vmor %vm713_vm3, %vm714_vm15 }
 0x310   :  { %v710_v58 = vsub.f32 1.0, %v709_v54 }
 0x312   :  { %574 = vadd.xlane.f32.xlu2 %v573_v36  ;;  %v711_v5 = vmul.f32 %v1800_v48, %v710_v58  ;;  %v720_v36 = vor.u32 1.1754944e-38, %v719_v63 }
 0x314   :  { %v1802_v49 = vpop.xlane.xlu0 %562  ;;  %v712_v37 = vadd.f32 %v1800_v48, %v711_v5 }
 0x315   :  { %vm698_vm3 = vweird.f32 %v1802_v49 }
 0x316   :  { %v716_v17 = vsel %vm1853_vm6, %v1800_v48, %v712_v37 }
 0x31a   :  { %577 = vadd.xlane.f32.xlu2 %v576_v19 }
 0x322   :  { %580 = vadd.xlane.f32.xlu2 %v579_v46 }
 0x32c   :  { %v1795_v43 = vpop.xlane.xlu2 %559 }
 0x32d   :  { %1370 = vrcp.f32 %v1795_v43  ;;  %v689_v23 = vand.u32 2147483648, %v1795_v43  ;;  %vm683_vm8 = vweird.f32 %v1795_v43  ;;  %v687_v28 = vand.u32 2147483647, %v1795_v43 }
 0x32e   :  { %1372 = vrcp.f32 %v1762_v6 }
 0x32f   :  { %vm688_vm12 = vcmp.eq.f32.partialorder %v687_v28, 8.507059e+37 }
 0x333   :  { %v1804_v51 = vpop.eup %1370 }
 0x334   :  { %v557_v50 = vpop.xlane.xlu2 %556  ;;  %v1806_v52 = vpop.eup %1372  ;;  %v679_v56 = vmul.f32 %v1804_v51, %v1795_v43  ;;  %vm684_vm5 = vweird.f32 %v1804_v51  ;;  %v690_v43 = vor.u32 1.1754944e-38, %v689_v23 }
 0x335   :  { %1374 = vrcp.f32 %v557_v50  ;;  %v619_v27 = vmul.f32 %v1806_v52, %v1762_v6  ;;  %v674_v10 = vand.u32 2147483648, %v557_v50  ;;  %v672_v14 = vand.u32 2147483647, %v557_v50  ;;  %vm1865_vm9 = vmor %vm683_vm8, %vm684_vm5 }
 0x336   :  { %1376 = vrcp.f32 %v1802_v49  ;;  %v680_v33 = vsub.f32 1.0, %v679_v56  ;;  %vm668_vm2 = vweird.f32 %v557_v50  ;;  %v627_v56 = vand.u32 2147483647, %v1762_v6 }
 0x337   :  { %1378 = vrcp.f32 %v1770_v34  ;;  %v620_v2 = vsub.f32 1.0, %v619_v27  ;;  %v675_v26 = vor.u32 1.1754944e-38, %v674_v10  ;;  %vm673_vm7 = vcmp.eq.f32.partialorder %v672_v14, 8.507059e+37 }
 0x338   :  { %v681_v8 = vmul.f32 %v1804_v51, %v680_v33  ;;  %v629_v27 = vand.u32 2147483648, %v1762_v6  ;;  %vm624_vm13 = vweird.f32 %v1806_v52 }
 0x339   :  { %v621_v11 = vmul.f32 %v1806_v52, %v620_v2 }
 0x33a   :  { %1052 = vrot.lane.b32.xlu2 %v1621_v44, %s1506_s2  ;;  %v682_v40 = vadd.f32 %v1804_v51, %v681_v8 }
 0x33b   :  { %v1375_v59 = vpop.eup %1374 }
 0x33c   :  { %v1817_v60 = vpop.eup %1376  ;;  %v664_v62 = vmul.f32 %v1375_v59, %v557_v50  ;;  %v1820_v0 = vpop.xlane.xlu2 %571  ;;  %vm669_vm14 = vweird.f32 %v1375_v59  ;;  %v686_v48 = vsel %vm1865_vm9, %v1804_v51, %v682_v40  ;;  %v721_v50 = vsel %vm718_vm10, %v720_v36, %v716_v17 }
 0x33d   :  { %v1822_v1 = vpop.xlane.xlu1 %568  ;;  %v694_v44 = vmul.f32 %v1817_v60, %v1802_v49  ;;  %v1830_v29 = vpop.eup %1378  ;;  %vm1837_vm4 = vmor %vm668_vm2, %vm669_vm14  ;;  %v704_v51 = vand.u32 2147483648, %v1802_v49  ;;  %vm699_vm14 = vweird.f32 %v1817_v60  ;;  %v642_v17 = vand.u32 2147483647, %v1770_v34 }
 0x33e   :  { %v665_v7 = vsub.f32 1.0, %v664_v62  ;;  %1380 = vrcp.f32 %v1822_v1  ;;  %v634_v24 = vmul.f32 %v1830_v29, %v1770_v34  ;;  %v722_v62 = vmul.f32 %v1706_v55, %v721_v50  ;;  %vm1892_vm2 = vmor %vm623_vm11, %vm624_vm13 }
 0x33f   :  { %v695_v16 = vsub.f32 1.0, %v694_v44  ;;  %1382 = vrcp.f32 %v1820_v0  ;;  %v734_v55 = vand.u32 2147483648, %v1822_v1  ;;  %vm1906_vm5 = vmor %vm698_vm3, %vm699_vm14  ;;  %v732_v37 = vand.u32 2147483647, %v1822_v1 }
 0x340   :  { %v666_v9 = vmul.f32 %v1375_v59, %v665_v7  ;;  %v635_v58 = vsub.f32 1.0, %v634_v24  ;;  %v705_v4 = vor.u32 1.1754944e-38, %v704_v51  ;;  %vm639_vm10 = vweird.f32 %v1830_v29 }
 0x341   :  { %v696_v47 = vmul.f32 %v1817_v60, %v695_v16  ;;  %v735_v63 = vor.u32 1.1754944e-38, %v734_v55  ;;  %vm733_vm9 = vcmp.eq.f32.partialorder %v732_v37, 8.507059e+37  ;;  %vm638_vm11 = vweird.f32 %v1770_v34 }
 0x342   :  { %v667_v15 = vadd.f32 %v1375_v59, %v666_v9  ;;  %vm643_vm13 = vcmp.eq.f32.partialorder %v642_v17, 8.507059e+37 }
 0x343   :  { %v697_v2 = vadd.f32 %v1817_v60, %v696_v47 }
 0x344   :  { %v1841_v35 = vpop.eup %1380  ;;  %v1845_v3 = vpop.xlane.xlu2 %583  ;;  %v671_v21 = vsel %vm1837_vm4, %v1375_v59, %v667_v15  ;;  %v691_v59 = vsel %vm688_vm12, %v690_v43, %v686_v48  ;;  %vm728_vm4 = vweird.f32 %v1822_v1  ;;  %v630_v15 = vor.u32 1.1754944e-38, %v629_v27  ;;  %vm640_vm12 = vmor %vm638_vm11, %vm639_vm10  ;;  %v1395_v27 = vld [vmem:[#allocation7 + $0x18] sm:$0xff] }
 0x345   :  { %v724_v25 = vmul.f32 %v1841_v35, %v1822_v1  ;;  %v676_v32 = vsel %vm673_vm7, %v675_v26, %v671_v21  ;;  %v1886_v5 = vpop.eup %1382  ;;  %vm729_vm15 = vweird.f32 %v1841_v35  ;;  %v692_v10 = vmul.f32 %v1727_v13, %v691_v59 }
 0x346   :  { %v677_v46 = vmul.f32 %v1733_v20, %v676_v32  ;;  %v622_v20 = vadd.f32 %v1806_v52, %v621_v11  ;;  %v702_v11 = vand.u32 2147483647, %v1802_v49  ;;  %v636_v13 = vmul.f32 %v1830_v29, %v635_v58  ;;  %vm730_vm6 = vmor %vm728_vm4, %vm729_vm15  ;;  %v989_v32 = vpop.permute.xlu0 %988 }
 0x347   :  { %v725_v19 = vsub.f32 1.0, %v724_v25  ;;  %v739_v49 = vmul.f32 %v1886_v5, %v1820_v0  ;;  %vm628_vm7 = vcmp.eq.f32.partialorder %v627_v56, 8.507059e+37  ;;  %vm744_vm14 = vweird.f32 %v1886_v5  ;;  %v1394_v56 = vld [vmem:[#allocation7 + $0x10] sm:$0xff] }
 0x348   :  { %1261 = vmatmul.msk.f32.gmra.mxu3 %vm211_vm1, %v677_v46  ;;  %v626_v14 = vsel %vm1892_vm2, %v1806_v52, %v622_v20  ;;  %v701_v52 = vsel %vm1906_vm5, %v1817_v60, %v697_v2  ;;  %vm703_vm8 = vcmp.eq.f32.partialorder %v702_v11, 8.507059e+37  ;;  %v637_v24 = vadd.f32 %v1830_v29, %v636_v13 }
 0x349   :  { %v726_v54 = vmul.f32 %v1841_v35, %v725_v19  ;;  %v631_v16 = vsel %vm628_vm7, %v630_v15, %v626_v14  ;;  %v706_v18 = vsel %vm703_vm8, %v705_v4, %v701_v52  ;;  %v740_v40 = vsub.f32 1.0, %v739_v49 }
 0x34a   :  { %v644_v60 = vand.u32 2147483648, %v1770_v34  ;;  %v707_v25 = vmul.f32 %v1715_v61, %v706_v18  ;;  %v641_v38 = vsel %vm640_vm12, %v1830_v29, %v637_v24  ;;  %vm743_vm15 = vweird.f32 %v1820_v0 }
 0x34b   :  { %v727_v8 = vadd.f32 %v1841_v35, %v726_v54  ;;  %v741_v36 = vmul.f32 %v1886_v5, %v740_v40  ;;  %v747_v34 = vand.u32 2147483647, %v1820_v0  ;;  %vm745_vm2 = vmor %vm743_vm15, %vm744_vm14  ;;  %1384 = vrcp.f32 %v1845_v3 }
 0x34c   :  { %v1316_v33 = vpop.permute.xlu2 %1315  ;;  %v645_v19 = vor.u32 1.1754944e-38, %v644_v60  ;;  %v1319_v20 = vpack.i.bf16 %v1394_v56, %v1395_v27  ;;  %v809_v14 = vand.u32 2147483648, %v1845_v3  ;;  %vm803_vm7 = vweird.f32 %v1845_v3 }
 0x34d   :  { %v1318_v7 = vunpack.i.h.bf16 %v1316_v33  ;;  %v1317_v44 = vunpack.i.l.bf16 %v1316_v33  ;;  %v731_v1 = vsel %vm730_vm6, %v1841_v35, %v727_v8  ;;  %v632_v35 = vmul.f32 %v1659_v12, %v631_v16 }
 0x34e   :  { %v736_v21 = vsel %vm733_vm9, %v735_v63, %v731_v1  ;;  %v646_v12 = vsel %vm643_vm13, %v645_v19, %v641_v38  ;;  %v742_v61 = vadd.f32 %v1886_v5, %v741_v36  ;;  %vm748_vm3 = vcmp.eq.f32.partialorder %v747_v34, 8.507059e+37  ;;  %1320 = vrot.lane.b32.xlu2 %v1319_v20, %s1510_s9 }
 0x34f   :  { %948 = vmatpush.msra.mxu0 %v1318_v7  ;;  %980 = vmatpush.msrb.mxu1 %v1317_v44  ;;  %v737_v28 = vmul.f32 %v1742_v45, %v736_v21  ;;  %v749_v45 = vand.u32 2147483648, %v1820_v0  ;;  %v647_v46 = vmul.f32 %v1681_v31, %v646_v12  ;;  %v1396_v7 = vld [vmem:[#allocation7] sm:$0xff]  ;;  %v1397_v44 = vld [vmem:[#allocation7 + $0x8] sm:$0xff]  ;;  %v807_v49 = vand.u32 2147483647, %v1845_v3 }
 0x350   :  { %1262 = vmatmul.msk.f32.vlgmr.msra.gmra.mxu0 %vm211_vm1, %v692_v10  ;;  %1264 = vmatmul.msk.f32.vlgmr.msrb.gmra.mxu1 %vm211_vm1, %v722_v62  ;;  %v746_v29 = vsel %vm745_vm2, %v1886_v5, %v742_v61  ;;  %v1324_v8 = vpack.i.bf16 %v1396_v7, %v1397_v44  ;;  %v810_v18 = vor.u32 1.1754944e-38, %v809_v14  ;;  %v854_v56 = vpop.f32.mrf.mxu1 }
 0x351   :  { %v750_v47 = vor.u32 1.1754944e-38, %v749_v45  ;;  %v1385_v54 = vpop.eup %1384  ;;  %vm808_vm11 = vcmp.eq.f32.partialorder %v807_v49, 8.507059e+37 }
 0x352   :  { %v799_v0 = vmul.f32 %v1385_v54, %v1845_v3  ;;  %vm804_vm5 = vweird.f32 %v1385_v54 }
 0x353   :  { %v751_v48 = vsel %vm748_vm3, %v750_v47, %v746_v29  ;;  %vm805_vm9 = vmor %vm803_vm7, %vm804_vm5 }
 0x354   :  { %v1311_v26 = vpop.permute.xlu1 %1310  ;;  %v752_v50 = vmul.f32 %v1740_v39, %v751_v48  ;;  %v800_v58 = vsub.f32 1.0, %v799_v0 }
 0x355   :  { %v1313_v42 = vunpack.i.h.bf16 %v1311_v26  ;;  %v1312_v23 = vunpack.i.l.bf16 %v1311_v26 }
 0x356   :  { %v801_v62 = vmul.f32 %v1385_v54, %v800_v58  ;;  %1325 = vrot.lane.b32.xlu2 %v1324_v8, %s1510_s9 }
 0x357   :  { %884 = vmatpush.msra.mxu2 %v1312_v23  ;;  %1044 = vmatpush.msrb.mxu3 %v1313_v42 }
 0x358   :  { %1258 = vmatmul.msk.f32.vlgmr.msra.gmra.mxu2 %vm211_vm1, %v632_v35  ;;  %1263 = vmatmul.msk.f32.gmra.mxu0 %vm211_vm1, %v707_v25  ;;  %v802_v11 = vadd.f32 %v1385_v54, %v801_v62  ;;  %v857_v20 = vpop.f32.mrf.mxu1 }
 0x359   :  { %1265 = vmatmul.msk.f32.gmra.mxu1 %vm211_vm1, %v737_v28  ;;  %1012 = vmatpush.msrb.mxu2 %v989_v32 }
 0x35a   :  { %v806_v63 = vsel %vm805_vm9, %v1385_v54, %v802_v11 }
 0x35b   :  { %v811_v60 = vsel %vm808_vm11, %v810_v18, %v806_v63  ;;  %vm1141_vm11 = vcmask 195584  }
 0x35c   :  { %v812_v28 = vmul.f32 %v1748_v53, %v811_v60 }
 0x360   :  { %1259 = vmatmul.msk.f32.gmra.mxu2 %vm211_vm1, %v647_v46 }
 0x368   :  { %1266 = vmatmul.msk.f32.vlgmr.msrb.gmra.mxu2 %vm211_vm1, %v752_v50 }
 0x37f   :  { %v1946_v43 = vpop.xlane.xlu1 %586 }
 0x380   :  { %1386 = vrcp.f32 %v1946_v43  ;;  %vm818_vm15 = vweird.f32 %v1946_v43  ;;  %v824_v17 = vand.u32 2147483648, %v1946_v43  ;;  %v822_v19 = vand.u32 2147483647, %v1946_v43 }
 0x382   :  { %v825_v46 = vor.u32 1.1754944e-38, %v824_v17  ;;  %vm823_vm5 = vcmp.eq.f32.partialorder %v822_v19, 8.507059e+37 }
 0x385   :  { %v575_v31 = vpop.xlane.xlu2 %574 }
 0x386   :  { %1388 = vrcp.f32 %v575_v31  ;;  %v1950_v59 = vpop.eup %1386  ;;  %v764_v9 = vand.u32 2147483648, %v575_v31  ;;  %v762_v10 = vand.u32 2147483647, %v575_v31  ;;  %vm758_vm6 = vweird.f32 %v575_v31 }
 0x387   :  { %v814_v2 = vmul.f32 %v1950_v59, %v1946_v43  ;;  %vm819_vm14 = vweird.f32 %v1950_v59 }
 0x388   :  { %v765_v52 = vor.u32 1.1754944e-38, %v764_v9  ;;  %vm763_vm10 = vcmp.eq.f32.partialorder %v762_v10, 8.507059e+37 }
 0x389   :  { %v815_v6 = vsub.f32 1.0, %v814_v2 }
 0x38b   :  { %v816_v40 = vmul.f32 %v1950_v59, %v815_v6  ;;  %v1398_v6 = vld [vmem:[%s2017_s3] ss:$0 sm:$0xff]  ;;  %s1513_s3 = smov [#allocation8]  }
 0x38c   :  { %v1389_v39 = vpop.eup %1388  ;;  %s1210_s14 = sshll.u32 %s1513_s3, 4  ;;  %s1211_s14 = int_to_ptr.vmem [resolvable:$true] %s1210_s14 }
 0x38d   :  { %v754_v51 = vmul.f32 %v1389_v39, %v575_v31  ;;  %v578_v33 = vpop.xlane.xlu2 %577  ;;  %vm759_vm4 = vweird.f32 %v1389_v39  ;;  %v817_v35 = vadd.f32 %v1950_v59, %v816_v40 }
 0x38e   :  { %1390 = vrcp.f32 %v578_v33  ;;  %vm760_vm8 = vmor %vm758_vm6, %vm759_vm4  ;;  %v779_v24 = vand.u32 2147483648, %v578_v33  ;;  %v777_v42 = vand.u32 2147483647, %v578_v33  ;;  %vm773_vm13 = vweird.f32 %v578_v33 }
 0x38f   :  { %v755_v5 = vsub.f32 1.0, %v754_v51  ;;  %vm820_vm4 = vmor %vm818_vm15, %vm819_vm14 }
 0x390   :  { %vm778_vm3 = vcmp.eq.f32.partialorder %v777_v42, 8.507059e+37  ;;  %v821_v34 = vsel %vm820_vm4, %v1950_v59, %v817_v35 }
 0x391   :  { %v756_v55 = vmul.f32 %v1389_v39, %v755_v5  ;;  %v826_v48 = vsel %vm823_vm5, %v825_v46, %v821_v34  ;;  %v918_v27 = vpop.f32.mrf.mxu3 }
 0x392   :  { %v827_v54 = vmul.f32 %v1773_v41, %v826_v48 }
 0x393   :  { %v757_v37 = vadd.f32 %v1389_v39, %v756_v55 }
 0x394   :  { %v1391_v13 = vpop.eup %1390 }
 0x395   :  { %v769_v15 = vmul.f32 %v1391_v13, %v578_v33  ;;  %v581_v4 = vpop.xlane.xlu2 %580  ;;  %v761_v1 = vsel %vm760_vm8, %v1389_v39, %v757_v37  ;;  %vm774_vm12 = vweird.f32 %v1391_v13 }
 0x396   :  { %1392 = vrcp.f32 %v581_v4  ;;  %v766_v16 = vsel %vm763_vm10, %v765_v52, %v761_v1  ;;  %vm775_vm2 = vmor %vm773_vm13, %vm774_vm12  ;;  %v794_v29 = vand.u32 2147483648, %v581_v4  ;;  %v792_v53 = vand.u32 2147483647, %v581_v4 }
 0x397   :  { %v770_v26 = vsub.f32 1.0, %v769_v15  ;;  %v767_v21 = vmul.f32 %v1779_v30, %v766_v16  ;;  %v780_v30 = vor.u32 1.1754944e-38, %v779_v24  ;;  %vm788_vm7 = vweird.f32 %v581_v4 }
 0x398   :  { %v795_v43 = vor.u32 1.1754944e-38, %v794_v29  ;;  %vm793_vm9 = vcmp.eq.f32.partialorder %v792_v53, 8.507059e+37  ;;  %vm1136_vm10 = vcmask 130048  }
 0x399   :  { %v771_v3 = vmul.f32 %v1391_v13, %v770_v26  ;;  %1267 = vmatmul.msk.f32.gmra.mxu2 %vm211_vm1, %v767_v21 }
 0x39b   :  { %v772_v23 = vadd.f32 %v1391_v13, %v771_v3 }
 0x39c   :  { %v1393_v25 = vpop.eup %1392 }
 0x39d   :  { %v776_v32 = vsel %vm775_vm2, %v1391_v13, %v772_v23  ;;  %v784_v36 = vmul.f32 %v1393_v25, %v581_v4  ;;  %v1053_v38 = vpop.permute.xlu2 %1052  ;;  %vm789_vm6 = vweird.f32 %v1393_v25 }
 0x39e   :  { %v781_v12 = vsel %vm778_vm3, %v780_v30, %v776_v32  ;;  %1076 = vmatpush.msrb.mxu0 %v1053_v38  ;;  %vm790_vm8 = vmor %vm788_vm7, %vm789_vm6 }
 0x39f   :  { %v785_v61 = vsub.f32 1.0, %v784_v36  ;;  %1270 = vmatmul.msk.f32.vlgmr.msrb.gmra.mxu0 %vm211_vm1, %v812_v28  ;;  %v782_v45 = vmul.f32 %v1785_v22, %v781_v12 }
 0x3a1   :  { %v786_v47 = vmul.f32 %v1393_v25, %v785_v61  ;;  %1268 = vmatmul.msk.f32.vlgmr.msrb.gmra.mxu3 %vm211_vm1, %v782_v45 }
 0x3a3   :  { %v787_v50 = vadd.f32 %v1393_v25, %v786_v47 }
 0x3a5   :  { %v791_v31 = vsel %vm790_vm8, %v1393_v25, %v787_v50 }
 0x3a6   :  { %v796_v22 = vsel %vm793_vm9, %v795_v43, %v791_v31 }
 0x3a7   :  { %1271 = vmatmul.msk.f32.gmra.mxu0 %vm211_vm1, %v827_v54  ;;  %v797_v0 = vmul.f32 %v1789_v57, %v796_v22 }
 0x3a8   :  { %v1321_v51 = vpop.permute.xlu2 %1320 }
 0x3a9   :  { %1269 = vmatmul.msk.f32.gmra.mxu3 %vm211_vm1, %v797_v0  ;;  %v1323_v57 = vunpack.i.h.bf16 %v1321_v51  ;;  %v1322_v33 = vunpack.i.l.bf16 %v1321_v51 }
 0x3ab   :  { %1185 = vmatpush.msra.mxu1 %v1322_v33 }
 0x3ad   :  { %1186 = vmatpush.msra.mxu1 %v1323_v57 }
 0x3b0   :  { %v1326_v62 = vpop.permute.xlu2 %1325 }
 0x3b1   :  { %v1328_v2 = vunpack.i.h.bf16 %v1326_v62  ;;  %v1327_v5 = vunpack.i.l.bf16 %v1326_v62 }
 0x3b3   :  { %1187 = vmatpush.msra.mxu1 %v1327_v5 }
 0x3b5   :  { %1188 = vmatpush.msra.mxu1 %v1328_v2 }
 0x3cb   :  { %v921_v58 = vpop.f32.mrf.mxu3 }
 0x3cc   :  { %1090 = vrot.lane.b32.xlu2 %v921_v58, %s1503_s24 }
 0x3cd   :  { %v982_v59 = vpop.f32.mrf.mxu1  ;;  %v950_v39 = vpop.f32.mrf.mxu0 }
 0x3ce   :  { %1104 = vrot.lane.b32.xlu0 %v982_v59, %s1511_s10 }
 0x3d5   :  { %v953_v7 = vpop.f32.mrf.mxu0 }
 0x3d6   :  { %1088 = vrot.lane.b32.xlu0 %v918_v27, %s1503_s24  ;;  %v985_v41 = vpop.f32.mrf.mxu1 }
 0x3db   :  { %v886_v8 = vpop.f32.mrf.mxu2 }
 0x3de   :  { %1106 = vrot.lane.b32.xlu0 %v985_v41, %s1511_s10 }
 0x3e3   :  { %v889_v10 = vpop.f32.mrf.mxu2 }
 0x3e6   :  { %1092 = vrot.lane.b32.xlu0 %v950_v39, %s1503_s24 }
 0x3eb   :  { %v1014_v14 = vpop.f32.mrf.mxu2 }
 0x41c   :  { %v1078_v44 = vpop.f32.mrf.mxu0  ;;  %v1017_v37 = vpop.f32.mrf.mxu2 }
 0x41d   :  { %1124 = vrot.lane.b32.xlu0 %v1078_v44, %s1512_s11 }
 0x424   :  { %v1046_v9 = vpop.f32.mrf.mxu3  ;;  %v1081_v55 = vpop.f32.mrf.mxu0 }
 0x425   :  { %1126 = vrot.lane.b32.xlu0 %v1081_v55, %s1512_s11  ;;  %1120 = vrot.lane.b32.xlu1 %v1046_v9, %s1512_s11 }
 0x426   :  { %v1091_v52 = vpop.permute.xlu2 %1090 }
 0x427   :  { %v1133_v26 = vsel %vm211_vm1, %v857_v20, %v1091_v52 }
 0x42c   :  { %v1049_v11 = vpop.f32.mrf.mxu3 }
 0x42d   :  { %1094 = vrot.lane.b32.xlu1 %v953_v7, %s1503_s24  ;;  %1122 = vrot.lane.b32.xlu2 %v1049_v11, %s1512_s11 }
 0x435   :  { %1108 = vrot.lane.b32.xlu2 %v1014_v14, %s1511_s10  ;;  %1158 = vrot.lane.b32.xlu1 %v1398_v6, %s1510_s9 }
 0x43d   :  { %1110 = vrot.lane.b32.xlu2 %v1017_v37, %s1511_s10 }
 0x440   :  { %v1105_v13 = vpop.permute.xlu0 %1104 }
 0x448   :  { %v1089_v49 = vpop.permute.xlu0 %1088 }
 0x449   :  { %v1132_v4 = vsel %vm211_vm1, %v854_v56, %v1089_v49 }
 0x44a   :  { %v1137_v1 = vsel %vm1136_vm10, %v1132_v4, %v1105_v13 }
 0x450   :  { %v1107_v15 = vpop.permute.xlu0 %1106 }
 0x451   :  { %v1138_v21 = vsel %vm1136_vm10, %v1133_v26, %v1107_v15 }
 0x458   :  { %v1093_v40 = vpop.permute.xlu0 %1092 }
 0x459   :  { %v1134_v3 = vsel %vm211_vm1, %v886_v8, %v1093_v40 }
 0x487   :  { %v1123_v16 = vpop.permute.xlu2 %1122 }
 0x488   :  { %v1143_v24 = vsel %vm1141_vm11, %v1138_v21, %v1123_v16 }
 0x48f   :  { %v1109_v60 = vpop.permute.xlu2 %1108  ;;  %v1125_v42 = vpop.permute.xlu0 %1124 }
 0x490   :  { %v1139_v23 = vsel %vm1136_vm10, %v1134_v3, %v1109_v60 }
 0x491   :  { %v1144_v25 = vsel %vm1141_vm11, %v1139_v23, %v1125_v42 }
 0x497   :  { %v1121_v63 = vpop.permute.xlu1 %1120  ;;  %v1111_v30 = vpop.permute.xlu2 %1110 }
 0x498   :  { %v1142_v18 = vsel %vm1141_vm11, %v1137_v1, %v1121_v63  ;;  %v1127_v32 = vpop.permute.xlu0 %1126 }
 0x499   :  { %1272 = vmatmul.msk.f32.vlgmr.msra.gmra.mxu1 %vm79_vm0, %v1142_v18 }
 0x49f   :  { %v1095_v35 = vpop.permute.xlu1 %1094 }
 0x4a0   :  { %v1135_v17 = vsel %vm211_vm1, %v889_v10, %v1095_v35 }
 0x4a1   :  { %1273 = vmatmul.msk.f32.gmra.mxu1 %vm79_vm0, %v1143_v24  ;;  %v1140_v28 = vsel %vm1136_vm10, %v1135_v17, %v1111_v30 }
 0x4a2   :  { %v1145_v36 = vsel %vm1141_vm11, %v1140_v28, %v1127_v32 }
 0x4a7   :  { %v1159_v38 = vpop.permute.xlu1 %1158 }
 0x4a9   :  { %1274 = vmatmul.msk.f32.gmra.mxu1 %vm79_vm0, %v1144_v25 }
 0x4b1   :  { %1275 = vmatmul.msk.f32.gmra.mxu1 %vm79_vm0, %v1145_v36 }
 0x516   :  { %v1190_v19 = vpop.f32.mrf.mxu1 }
 0x517   :  { %v1191_v12 = vadd.f32 %v1190_v19, %v1159_v38 }
 0x519   :  { %1202 = vst.msk [vmem:[#allocation8] sm:$0xff] %vm79_vm0, %v1191_v12 }
 0x51e   :  { %v1193_v61 = vpop.f32.mrf.mxu1 }
 0x51f   :  { %v1194_v45 = vadd.f32 %v1193_v61, %v1159_v38 }
 0x521   :  { %1203 = vst.msk [vmem:[#allocation8 + $0x8] sm:$0xff] %vm79_vm0, %v1194_v45 }
 0x526   :  { %v1196_v34 = vpop.f32.mrf.mxu1 }
 0x527   :  { %v1197_v46 = vadd.f32 %v1196_v34, %v1159_v38 }
 0x529   :  { %1204 = vst.msk [vmem:[#allocation8 + $0x10] sm:$0xff] %vm79_vm0, %v1197_v46 }
 0x52e   :  { %v1199_v29 = vpop.f32.mrf.mxu1 }
 0x52f   :  { %v1200_v47 = vadd.f32 %v1199_v29, %v1159_v38 }
 0x531   :  { %1205 = vst.msk [vmem:[#allocation8 + $0x18] sm:$0xff] %vm79_vm0, %v1200_v47 }
 0x532   :  { %1218 = dma.vmem_to_hbm [thread:$0]  %s1211_s14, 512, %s1213_s17, [#allocation4], %s1502_s23, %s1502_s23, %s1503_s24  }
 0x533   :  { %1499 = dma.done.wait [#allocation4], 512  }
 0x534   :  { %1500 = vsyncadd [#allocation4], 4294966784 }
 0x535   :  { %1223 = vsyncpa [#allocation3], 1 }
 0x536   :  { %1224 = vsyncpa [#allocation6], 1 }
 0x537   :  { %1225 = vsyncpa [#allocation4], 1 }

</bundles_post_ra>
